<compile_context>
chip_gen: v7x
topology: tpu7x:2x2x1
jax: 0.10.0
libtpu: 0.0.40
codegen_flags: <defaults>
</compile_context>

<pallas_src>
import jax
import jax.numpy as jnp
from jax.experimental import pallas as pl
from jax.experimental.pallas import tpu as pltpu


def _outconv_kernel(x_ref, w_ref, b_ref, o_ref):
    """One tile of the 1x1 conv.

    x_ref: (Cin, THW)   w_ref: (Cout, Cin)   b_ref: (Cout, 1)   o_ref: (Cout, THW)
    Spatial (THW) is the lane axis -> full unmasked vector stores.
    """
    x = x_ref[...]
    w = w_ref[...]
    b = b_ref[...].astype(jnp.float32)
    cin = x.shape[0]

    if cin <= 16:
        # Tiny contraction (e.g. Cin=4, Cout=3): unrolled VPU FMA over Cin avoids
        # pushing a degenerate matmul through the MXU result FIFO.
        acc = jnp.zeros(o_ref.shape, jnp.float32)
        for c in range(cin):
            acc = acc + (w[:, c:c + 1].astype(jnp.float32)
                         * x[c:c + 1, :].astype(jnp.float32))
    else:
        # Larger channel counts: use the MXU with f32 accumulation.
        acc = jnp.dot(w, x, preferred_element_type=jnp.float32)

    o_ref[...] = (acc + b).astype(o_ref.dtype)


def _choose_tile_hw(hw, cin, cout, itemsize,
                    vmem_budget_bytes=12 * 1024 * 1024, max_tile=16384):
    """Largest lane-dense (multiple of 128) spatial tile such that the
    double-buffered input + output tiles stay well under the default scoped
    VMEM on all of v5e (16 MiB) / v6e / v7x (32 MiB)."""
    hw_lanes = ((hw + 127) // 128) * 128
    per_lane = 2 * (cin + cout) * itemsize          # 2x = double buffering
    cap = max(128, (vmem_budget_bytes // max(per_lane, 1)) // 128 * 128)
    return int(min(hw_lanes, cap, max_tile))


def outconv_1x1(x_nchw, weight, bias):
    """Forward of OutConv: 1x1 Conv2d, stride 1, no padding. NCHW in / NCHW out.

    x_nchw: (N, Cin, H, W)
    weight: (Cout, Cin, 1, 1) or (Cout, Cin)   (PyTorch conv weight)
    bias:   (Cout,)
    """
    N, Cin, H, W = x_nchw.shape
    w2d = weight.reshape(weight.shape[0], Cin)      # (Cout, Cin)
    Cout = w2d.shape[0]
    HW = H * W
    itemsize = jnp.dtype(x_nchw.dtype).itemsize

    tile_hw = _choose_tile_hw(HW, Cin, Cout, itemsize)
    num_tiles = pl.cdiv(HW, tile_hw)
    HW_pad = num_tiles * tile_hw

    # Free reshape (no transpose / extra HBM pass); pad spatial axis only if the
    # shape is not tile-friendly, and slice the pad back off at the end.
    x3 = x_nchw.reshape(N, Cin, HW)
    if HW_pad != HW:
        x3 = jnp.pad(x3, ((0, 0), (0, 0), (0, HW_pad - HW)))

    b_col = bias.reshape(Cout, 1)

    cost = pl.CostEstimate(
        flops=2 * N * HW * Cin * Cout,
        transcendentals=0,
        bytes_accessed=(N * Cin * HW_pad + N * Cout * HW_pad
                        + w2d.size + bias.size) * itemsize,
    )

    out3 = pl.pallas_call(
        _outconv_kernel,
        out_shape=jax.ShapeDtypeStruct((N, Cout, HW_pad), x_nchw.dtype),
        grid_spec=pltpu.PrefetchScalarGridSpec(
            num_scalar_prefetch=0,
            grid=(N, num_tiles),
            in_specs=[
                # batch dim squeezed; spatial (lane) axis tiled.
                pl.BlockSpec((None, Cin, tile_hw), lambda n, j: (n, 0, j)),
                pl.BlockSpec((Cout, Cin), lambda n, j: (0, 0)),   # resident weight
                pl.BlockSpec((Cout, 1), lambda n, j: (0, 0)),     # resident bias
            ],
            out_specs=pl.BlockSpec((None, Cout, tile_hw), lambda n, j: (n, 0, j)),
        ),
        compiler_params=pltpu.CompilerParams(
            dimension_semantics=("parallel", "parallel")),
        cost_estimate=cost,
    )(x3, w2d, b_col)

    if HW_pad != HW:
        out3 = out3[:, :, :HW]
    return out3.reshape(N, Cout, H, W)


if __name__ == "__main__":
    key = jax.random.PRNGKey(0)
    k_x, k_w, k_b = jax.random.split(key, 3)

    N, Cin, H, W = 2, 4, 16, 16
    Cout = 3

    x = jax.random.normal(k_x, (N, Cin, H, W), dtype=jnp.float32)
    # Same parameter shapes as nn.Conv2d(Cin, Cout, kernel_size=1)
    weight = jax.random.normal(k_w, (Cout, Cin, 1, 1), dtype=jnp.float32) * 0.1
    bias = jax.random.normal(k_b, (Cout,), dtype=jnp.float32) * 0.1

    out = outconv_1x1(x, weight, bias)
    out = jax.block_until_ready(out)

    # Pure-JAX reference
    ref = (jnp.einsum("nchw,oc->nohw", x, weight.reshape(Cout, Cin))
           + bias[None, :, None, None])
    assert out.shape == (N, Cout, H, W)
    assert jnp.allclose(out, ref, atol=1e-5, rtol=1e-5)

    print("KERNEL_OK")
</pallas_src>

<mosaic_0001>
module attributes {stable_mosaic.version = 11 : i64} {
  func.func @_outconv_kernel(%arg0: i32, %arg1: i32, %arg2: memref<1x4x256xf32, #tpu.memory_space<vmem>>, %arg3: memref<3x4xf32, #tpu.memory_space<vmem>>, %arg4: memref<3x1xf32, #tpu.memory_space<vmem>>, %arg5: memref<1x3x256xf32, #tpu.memory_space<vmem>>) attributes {dimension_semantics = [#tpu.dimension_semantics<parallel>, #tpu.dimension_semantics<parallel>], iteration_bounds = array<i64: 2, 1>, scalar_prefetch = 0 : i64, scratch_operands = 0 : i64, tpu.core_type = #tpu.core_type<tc>, window_params = [{transform_indices = @transform_0, window_bounds = array<i64: 1, 4, 256>}, {pipeline_mode = #tpu.pipeline_mode<synchronous>, transform_indices = @transform_1, window_bounds = array<i64: 3, 4>}, {pipeline_mode = #tpu.pipeline_mode<synchronous>, transform_indices = @transform_2, window_bounds = array<i64: 3, 1>}, {transform_indices = @transform_3, window_bounds = array<i64: 1, 3, 256>}]} {
    %c0 = arith.constant 0 : index
    %c0_0 = arith.constant 0 : index
    %c0_1 = arith.constant 0 : index
    %0 = vector.load %arg2[%c0, %c0_0, %c0_1] : memref<1x4x256xf32, #tpu.memory_space<vmem>>, vector<1x4x256xf32>
    %1 = vector.shape_cast %0 : vector<1x4x256xf32> to vector<4x256xf32>
    %c0_2 = arith.constant 0 : index
    %c0_3 = arith.constant 0 : index
    %2 = vector.load %arg3[%c0_2, %c0_3] : memref<3x4xf32, #tpu.memory_space<vmem>>, vector<3x4xf32>
    %c0_4 = arith.constant 0 : index
    %c0_5 = arith.constant 0 : index
    %3 = vector.load %arg4[%c0_4, %c0_5] : memref<3x1xf32, #tpu.memory_space<vmem>>, vector<3x1xf32>
    %cst = arith.constant 0.000000e+00 : f32
    %4 = vector.broadcast %cst : f32 to vector<3x256xf32>
    %5 = vector.extract_strided_slice %2 {offsets = [0, 0], sizes = [3, 1], strides = [1, 1]} : vector<3x4xf32> to vector<3x1xf32>
    %6 = vector.extract_strided_slice %1 {offsets = [0, 0], sizes = [1, 256], strides = [1, 1]} : vector<4x256xf32> to vector<1x256xf32>
    %7 = vector.broadcast %5 : vector<3x1xf32> to vector<3x256xf32>
    %8 = vector.broadcast %6 : vector<1x256xf32> to vector<3x256xf32>
    %9 = arith.mulf %7, %8 : vector<3x256xf32>
    %10 = arith.addf %4, %9 : vector<3x256xf32>
    %11 = vector.extract_strided_slice %2 {offsets = [0, 1], sizes = [3, 1], strides = [1, 1]} : vector<3x4xf32> to vector<3x1xf32>
    %12 = vector.extract_strided_slice %1 {offsets = [1, 0], sizes = [1, 256], strides = [1, 1]} : vector<4x256xf32> to vector<1x256xf32>
    %13 = vector.broadcast %11 : vector<3x1xf32> to vector<3x256xf32>
    %14 = vector.broadcast %12 : vector<1x256xf32> to vector<3x256xf32>
    %15 = arith.mulf %13, %14 : vector<3x256xf32>
    %16 = arith.addf %10, %15 : vector<3x256xf32>
    %17 = vector.extract_strided_slice %2 {offsets = [0, 2], sizes = [3, 1], strides = [1, 1]} : vector<3x4xf32> to vector<3x1xf32>
    %18 = vector.extract_strided_slice %1 {offsets = [2, 0], sizes = [1, 256], strides = [1, 1]} : vector<4x256xf32> to vector<1x256xf32>
    %19 = vector.broadcast %17 : vector<3x1xf32> to vector<3x256xf32>
    %20 = vector.broadcast %18 : vector<1x256xf32> to vector<3x256xf32>
    %21 = arith.mulf %19, %20 : vector<3x256xf32>
    %22 = arith.addf %16, %21 : vector<3x256xf32>
    %23 = vector.extract_strided_slice %2 {offsets = [0, 3], sizes = [3, 1], strides = [1, 1]} : vector<3x4xf32> to vector<3x1xf32>
    %24 = vector.extract_strided_slice %1 {offsets = [3, 0], sizes = [1, 256], strides = [1, 1]} : vector<4x256xf32> to vector<1x256xf32>
    %25 = vector.broadcast %23 : vector<3x1xf32> to vector<3x256xf32>
    %26 = vector.broadcast %24 : vector<1x256xf32> to vector<3x256xf32>
    %27 = arith.mulf %25, %26 : vector<3x256xf32>
    %28 = arith.addf %22, %27 : vector<3x256xf32>
    %29 = vector.broadcast %3 : vector<3x1xf32> to vector<3x256xf32>
    %30 = arith.addf %28, %29 : vector<3x256xf32>
    %c0_6 = arith.constant 0 : index
    %c0_7 = arith.constant 0 : index
    %c0_8 = arith.constant 0 : index
    %31 = vector.load %arg5[%c0_6, %c0_7, %c0_8] : memref<1x3x256xf32, #tpu.memory_space<vmem>>, vector<1x3x256xf32>
    %32 = vector.shape_cast %31 : vector<1x3x256xf32> to vector<3x256xf32>
    %33 = vector.shape_cast %30 : vector<3x256xf32> to vector<1x3x256xf32>
    tpu.vector_store %arg5[%c0_6, %c0_7, %c0_8], %33 {strides = array<i32>} : memref<1x3x256xf32, #tpu.memory_space<vmem>>, vector<1x3x256xf32>,
    return
  }
  func.func @transform_0(%arg0: i32, %arg1: i32) -> (i32, i32, i32) {
    %c0_i32 = arith.constant 0 : i32
    %c0_i32_0 = arith.constant 0 : i32
    return %arg0, %c0_i32, %arg1 : i32, i32, i32
  }
  func.func @transform_1(%arg0: i32, %arg1: i32) -> (i32, i32) {
    %c0_i32 = arith.constant 0 : i32
    %c0_i32_0 = arith.constant 0 : i32
    %c0_i32_1 = arith.constant 0 : i32
    return %c0_i32, %c0_i32_0 : i32, i32
  }
  func.func @transform_2(%arg0: i32, %arg1: i32) -> (i32, i32) {
    %c0_i32 = arith.constant 0 : i32
    %c0_i32_0 = arith.constant 0 : i32
    %c0_i32_1 = arith.constant 0 : i32
    return %c0_i32, %c0_i32_0 : i32, i32
  }
  func.func @transform_3(%arg0: i32, %arg1: i32) -> (i32, i32, i32) {
    %c0_i32 = arith.constant 0 : i32
    %c0_i32_0 = arith.constant 0 : i32
    return %arg0, %c0_i32, %arg1 : i32, i32, i32
  }
}

</mosaic_0001>

<bundles_post_ra>
// kernel: tpu_custom_call.1
= control target key start
LH: loop header
LB: loop body
LE: loop exit
PB: predicated region body
PF: predicated region fallthrough
CT: control target
= control target key end

     0   :  { %8 = vsyncpa [#allocation3], 0  ;;  %s751_s0 = inlined_call_operand.hbm [shape: f32[2,4,256], index: 0, kind: input, shape index: {}]   ;;  %s752_s1 = inlined_call_operand.vmem [shape: f32[3,4], index: 1, kind: input, shape index: {}]   ;;  %s753_s2 = inlined_call_operand.vmem [shape: f32[3,1], index: 2, kind: input, shape index: {}]   ;;  %s754_s3 = inlined_call_operand.vmem [shape: f32[2,3,256], index: 3, kind: output, shape index: {}]  }
   0x1   :  { %10 = vsyncpa [#allocation3 + $0x1], 0  ;;  %s620_s12 = smov 0   ;;  %s622_s13 = smov 0  }
   0x2   :  { %s624_s14 = smov 0   ;;  %s626_s15 = smov 0  }
   0x3   :  { %s628_s16 = smov 0   ;;  %s630_s17 = smov 0  }
   0x4 LB: > { %s433_s18 = sadd.s32 4294967295, %s593_s17   ;;  %s28_s19 = sadd.s32 1, %s589_s16  ;;  %s593_s17 = sphi %s630_s17, %s16_s17   ;;  %s589_s16 = sphi %s628_s16, %s764_s16   ;;  %s585_s15 = sphi %s626_s15, %s763_s15   ;;  %s581_s14 = sphi %s624_s14, %s762_s14   ;;  %s577_s13 = sphi %s622_s13, %s761_s13   ;;  %s573_s12 = sphi %s620_s12, %s760_s12  }
   0x5   : > { %p30_p0 = scmp.ge.s32.totalorder %s28_s19, 2  ;;  %s37_s20 = sadd.s32 1, %s581_s14 }
   0x6   : > { %p44_p1 = scmp.ne.s32.totalorder %s581_s14, %s577_s13  ;;  %p45_p2 = scmp.eq.s32.totalorder %s593_s17, 0 }
   0x7   : > { %s766_s19 = smov (%p30_p0, %s28_s19), 0  ;;  %p50_p4 = scmp.ne.s32.totalorder %s577_s13, %s573_s12 }
   0x8   : > { %p656_p3 = por %p45_p2, %p44_p1  ;;  %s32_s22 = ssub.s32 %s589_s16, %s766_s19 }
   0x9   : > { %p51_p5 = scmp.eq.s32.totalorder %s433_s18, 0  ;;  %p35_p6 = scmp.eq.s32.totalorder %s32_s22, 0 }
   0xa   : > { %p454_p8 = scmp.lt.s32.totalorder %s593_s17, 2  ;;  %s150_s25 = sand.u32 1, %s581_s14  }
   0xb   : > { %p663_p7 = por %p51_p5, %p50_p4  ;;  %s446_s26 = sshll.u32 %s589_s16, 7 }
   0xc   : > { %s669_s24 = scalar_select %p35_p6, %s581_s14, %s37_s20  }
   0xd   : > { %s437_s27 = sshll.u32 %s150_s25, 3  ;;  %s676_s30 = scalar_lea.hbm %s751_s0, %s446_s26 }
   0xe   : > { %s154_s4 = scalar_lea.vmem [#allocation2], %s437_s27  ;;  %p680_p9 = pnand %p454_p8, %p656_p3 }
   0xf   : > { %s164_s5 = sshll.u32 %s154_s4, 4  ;;  %s151_s7 = scalar_lea.sflag [#allocation3], %s150_s25  ;;  %s684_s5 = int_to_ptr.vmem [resolvable:$true] %s164_s5 }
  0x10   : > { %s513_s8 = scalar_lea.hbm %s676_s30, 128  ;;  %p515_p13 = pneg %p680_p9 }
  0x11   : > { %p514_p12 = scmp.ne.s32.totalorder %s676_s30, %s513_s8  ;;  %s518_s11 = scalar_lea.hbm %s751_s0, 256 }
  0x12   : > { %p519_p2 = scmp.lt.u32.totalorder %s676_s30, %s751_s0  ;;  %p520_p3 = scmp.lt.u32.totalorder %s518_s11, %s513_s8 }
  0x13   : > { %p516_p0 = pnand %p515_p13, %p514_p12  ;;  %p522_p5 = scmp.lt.u32.totalorder %s513_s8, %s676_s30 }
  0x14   : > { %p521_p4 = por %p520_p3, %p519_p2 }
  0x15   : > { %p517_p1 = pneg %p516_p0 }
  0x16   : > { %p523_p6 = por %p522_p5, %p521_p4 }
  0x18   : > { %p524_p8 = pnand %p523_p6, %p517_p1 }
  0x1a   : > { %527 = shalt.err (!%p524_p8)
}
  0x1b   : > { %s528_s20 = scalar_lea.vmem %s684_s5, 128  ;;  %s595_s21 = smov [#allocation2]  }
  0x1c   : > { %p529_p12 = scmp.ne.s32.totalorder %s684_s5, %s528_s20  ;;  %s533_s22 = sshll.u32 %s595_s21, 4  ;;  %s534_s22 = int_to_ptr.vmem [resolvable:$false] %s533_s22 }
  0x1d   : > { %s535_s25 = scalar_lea.vmem %s534_s22, 256  ;;  %p536_p11 = scmp.lt.s32.totalorder %s684_s5, %s534_s22 }
  0x1e   : > { %p531_p0 = pnand %p529_p12, %p515_p13  ;;  %p537_p2 = scmp.lt.s32.totalorder %s535_s25, %s528_s20 }
  0x20   : > { %p532_p10 = pneg %p531_p0  ;;  %p538_p3 = por %p537_p2, %p536_p11 }
  0x22   : > { %p539_p4 = pnand %p538_p3, %p532_p10 }
  0x24   : > { %542 = shalt.err (!%p539_p4)
}
  0x25   : > { %453 = dma.hbm_to_vmem [thread:$0]  (!%p680_p9), %s676_s30, 128, %s684_s5, %s151_s7  }
  0x26   : > { %p758_p1 = scmp.lt.s32.totalorder %s593_s17, 3  ;;  %p759_p5 = scmp.ge.s32.totalorder %s593_s17, 1 }
  0x28   : > { %p170_p13 = pnand %p759_p5, %p758_p1 }
  0x29   : > { %s175_s26 = sand.u32 (!%p170_p13), 1, %s577_s13  }
  0x2a   : > { %173 = sbr.rel (%p170_p13) target bundleno = 198 (0xc6), region = 32  ;;  %s441_s27 = sshll.u32 (!%p170_p13), %s175_s26, 3 }
  0x2b   : > { %s176_s28 = scalar_lea.sflag (!%p170_p13), [#allocation3], %s175_s26  ;;  %s179_s29 = scalar_lea.vmem (!%p170_p13), [#allocation2], %s441_s27 }
  0x31   : > { %568 = dma.done.wait (%p663_p7), %s176_s28, 128  }
  0x32   : > { %570 = vsyncadd (%p663_p7), %s176_s28, 4294967168  ;;  %v596_v0 = vmov 0   ;;  %v597_v1 = vmov 2   ;;  %v218_v2 = vld [vmem:[%s752_s1] sm:$0x7]  ;;  %v598_v3 = vmov 1   ;;  %v226_v6 = vlaneseq }
  0x33   : > { %507 = vset.pattern.permute.xlu0 %v596_v0  ;;  %509 = vset.pattern.permute.xlu1 %v597_v1  ;;  %v599_v4 = vmov 3   ;;  %v219_v5 = vld [vmem:[%s753_s2] sm:$0x7]  ;;  %p208_p7 = scmp.lt.s32.totalorder %s585_s15, 1 }
  0x34   : > { %222 = vperm.xlu0 %507, %v218_v2   ;;  %275 = vperm.xlu1 %509, %v218_v2   ;;  %v227_v7 = vshrl.u32 %v226_v6, 7  ;;  %v217_v12 = vld [vmem:[%s179_s29] sm:$0xff] }
  0x35   : > { %s768_s15 = smov (!%p208_p7, %s585_s15), 1 }
  0x36   : > { %v228_v8 = vsub.s32 0, %v227_v7  ;;  %v232_v9 = vsub.s32 4, %v227_v7  ;;  %v254_v10 = vsub.s32 1, %v227_v7  ;;  %v258_v11 = vsub.s32 5, %v227_v7  ;;  %s447_s23 = sshll.u32 %s768_s15, 3 }
  0x37   : > { %v280_v13 = vsub.s32 2, %v227_v7  ;;  %v284_v14 = vsub.s32 6, %v227_v7  ;;  %v306_v15 = vsub.s32 3, %v227_v7  ;;  %v310_v16 = vsub.s32 7, %v227_v7  ;;  %s215_s9 = scalar_lea.vmem %s754_s3, %s447_s23 }
  0x38   : > { %508 = vset.pattern.permute.xlu0 %v598_v3  ;;  %510 = vset.pattern.permute.xlu1 %v599_v4  ;;  %v229_v17 = vrot.slane %v217_v12, %v228_v8  ;;  %v233_v18 = vrot.slane %v217_v12, %v232_v9  ;;  %v255_v19 = vrot.slane %v217_v12, %v254_v10 }
  0x39   : > { %249 = vperm.xlu0 %508, %v218_v2   ;;  %301 = vperm.xlu1 %510, %v218_v2   ;;  %v259_v20 = vrot.slane %v217_v12, %v258_v11  ;;  %v281_v21 = vrot.slane %v217_v12, %v280_v13  ;;  %v285_v22 = vrot.slane %v217_v12, %v284_v14 }
  0x3a   : > { %v307_v25 = vrot.slane %v217_v12, %v306_v15  ;;  %v311_v26 = vrot.slane %v217_v12, %v310_v16  ;;  %v239_v27 = vrot.slane %v229_v17, %v228_v8  ;;  %v243_v28 = vrot.slane %v233_v18, %v228_v8 }
  0x3b   : > { %v265_v29 = vrot.slane %v255_v19, %v254_v10  ;;  %v269_v30 = vrot.slane %v259_v20, %v254_v10  ;;  %v291_v31 = vrot.slane %v281_v21, %v280_v13  ;;  %v295_v32 = vrot.slane %v285_v22, %v280_v13 }
  0x3c   : > { %v317_v33 = vrot.slane %v307_v25, %v306_v15  ;;  %v321_v34 = vrot.slane %v311_v26, %v306_v15 }
  0x3d   : > { %511 = vset.pattern.permute.xlu1 %v596_v0  ;;  %512 = vset.pattern.permute.xlu0 %v596_v0 }
  0x3e   : > { %328 = vperm.xlu1 %511, %v219_v5  }
  0xb3   : > { %v223_v23 = vpop.permute.xlu0 %222  ;;  %v276_v24 = vpop.permute.xlu1 %275 }
  0xb4   : > { %v244_v37 = vmul.f32 %v239_v27, %v223_v23  ;;  %v245_v38 = vmul.f32 %v243_v28, %v223_v23  ;;  %v296_v41 = vmul.f32 %v291_v31, %v276_v24  ;;  %v297_v42 = vmul.f32 %v295_v32, %v276_v24 }
  0xb8   : > { %v250_v35 = vpop.permute.xlu0 %249  ;;  %v302_v36 = vpop.permute.xlu1 %301 }
  0xb9   : > { %v270_v39 = vmul.f32 %v265_v29, %v250_v35  ;;  %v271_v40 = vmul.f32 %v269_v30, %v250_v35  ;;  %v322_v45 = vmul.f32 %v317_v33, %v302_v36  ;;  %v323_v46 = vmul.f32 %v321_v34, %v302_v36 }
  0xbb   : > { %v272_v43 = vadd.f32 %v270_v39, %v244_v37  ;;  %v273_v44 = vadd.f32 %v271_v40, %v245_v38 }
  0xbd   : > { %v298_v47 = vadd.f32 %v296_v41, %v272_v43  ;;  %v299_v48 = vadd.f32 %v297_v42, %v273_v44  ;;  %v329_v49 = vpop.permute.xlu1 %328 }
  0xbf   : > { %v324_v50 = vadd.f32 %v322_v45, %v298_v47  ;;  %v325_v51 = vadd.f32 %v323_v46, %v299_v48 }
  0xc1   : > { %v331_v52 = vadd.f32 %v329_v49, %v324_v50  ;;  %v332_v53 = vadd.f32 %v329_v49, %v325_v51 }
  0xc3   : > { %v335_v54 = vcombine.low %v331_v52, %v332_v53 }
  0xc5   : > { %337 = vst [vmem:[%s215_s9] sm:$0x77] %v335_v54 }
  0xc6 PF: > { %s16_s17 = sadd.s32 1, %s593_s17   ;;  %s760_s12 = smov %s577_s13 }
  0xc7   : > { %p13_p9 = scmp.ge.s32.totalorder %s16_s17, 4   ;;  %s761_s13 = smov %s581_s14 }
  0xc8   : > { %s762_s14 = smov %s669_s24  ;;  %s763_s15 = smov %s589_s16 }
  0xc9   : > { %s764_s16 = smov %s766_s19  ;;  %15 = sbr.rel (!%p13_p9) target bundleno = 4 (0x4), region = 72 }
  0xd0   :  { %368 = vsyncpa [#allocation3], 1 }
  0xd1   :  { %370 = vsyncpa [#allocation3 + $0x1], 1 }

</bundles_post_ra>
